<compile_context>
chip_gen: v5e
topology: v5e:2x2
jax: 0.10.0
libtpu: 0.0.40
codegen_flags: <defaults>
</compile_context>

<pallas_src>
import functools

import jax
import jax.numpy as jnp
from jax.experimental import pallas as pl
from jax.experimental.pallas import tpu as pltpu


def _round_up(v, m):
    return (v + m - 1) // m * m


# ----------------------------------------------------------------------------
# Fused kernel: all Linear(+ReLU) layers in one body (static unroll).
# ----------------------------------------------------------------------------
def _mlp_kernel(*refs, n_layers, act_on_final):
    # refs = (x_ref, w0, b0, w1, b1, ..., o_ref)
    #   x_ref : (TB, Din0)        activation tile (f32 or bf16)
    #   w_i   : (Din_i, Dout_i)   pre-transposed, zero-padded, VMEM-resident
    #   b_i   : (1, Dout_i)       f32
    #   o_ref : (TB, Dout_last)   f32
    x_ref = refs[0]
    o_ref = refs[1 + 2 * n_layers]
    h = x_ref[...]
    for i in range(n_layers):                               # static unroll (small L)
        w_ref = refs[1 + 2 * i]
        b_ref = refs[2 + 2 * i]
        y = jnp.dot(h.astype(w_ref.dtype), w_ref[...],
                    preferred_element_type=jnp.float32)     # MXU, f32 accumulate
        y = y + b_ref[...]                                  # f32 epilogue
        if i < n_layers - 1 or act_on_final:
            y = jnp.maximum(y, 0.0)                         # ReLU (zero padding stays 0)
        h = y
    o_ref[...] = h.astype(o_ref.dtype)


def _resident_spec(shape):
    # Whole-array block with a constant index map => stays in VMEM for the
    # whole grid; Buffered(1) skips double-buffering the resident operand.
    idx = lambda i: (0, 0)
    try:
        return pl.BlockSpec(shape, idx, pipeline_mode=pl.Buffered(1))
    except (AttributeError, TypeError):
        return pl.BlockSpec(shape, idx)


# ----------------------------------------------------------------------------
# Jitted wrapper: padding, batch tiling, pallas_call, final slice.
# ----------------------------------------------------------------------------
@functools.partial(jax.jit, static_argnames=("n_out", "act_on_final"))
def _classifier_forward(x, ws, bs, *, n_out, act_on_final):
    B, n_in = x.shape
    n_layers = len(ws)
    mm_dtype = ws[0].dtype
    Din0 = ws[0].shape[0]
    Dout_last = ws[-1].shape[1]

    # ---- batch tiling --------------------------------------------------
    sub = 16 if mm_dtype == jnp.bfloat16 else 8             # sublane granularity
    if B <= 16:
        TB = max(_round_up(B, sub), sub)
        B_pad = TB
    elif B <= 1024:
        # Exactly 2 grid steps so v7x's two TensorCores both get a tile.
        TB = _round_up(-(-B // 2), sub)
        B_pad = 2 * TB
    else:
        TB = 512                                            # ~85% of HBM roofline
        B_pad = _round_up(B, TB)

    # Input padded only to round_up(n_in,128) lanes (not a global max width).
    x_pad = jnp.zeros((B_pad, Din0), mm_dtype).at[:B, :n_in].set(x.astype(mm_dtype))

    # ---- specs / operands ----------------------------------------------
    in_specs = [pl.BlockSpec((TB, Din0), lambda i: (i, 0))]  # batch-tiled activations
    operands = [x_pad]
    for w, b in zip(ws, bs):
        in_specs.append(_resident_spec(w.shape))             # VMEM-resident weight
        in_specs.append(_resident_spec(b.shape))             # VMEM-resident bias
        operands += [w, b]

    # ---- explicit VMEM budget -------------------------------------------
    resident = sum(a.size * a.dtype.itemsize for a in operands[1:])
    d_max = max([Din0] + [w.shape[1] for w in ws])
    stream = 2 * TB * Din0 * x_pad.dtype.itemsize + 2 * TB * Dout_last * 4
    act = 2 * TB * d_max * 4                                  # inter-layer activations
    vmem_limit = int(1.5 * (resident + stream + act)) + (4 << 20)
    vmem_limit = min(max(vmem_limit, 32 << 20), 100 << 20)

    kernel = functools.partial(_mlp_kernel, n_layers=n_layers,
                               act_on_final=act_on_final)

    out = pl.pallas_call(
        kernel,
        out_shape=jax.ShapeDtypeStruct((B_pad, Dout_last), jnp.float32),
        grid=(B_pad // TB,),
        in_specs=in_specs,
        out_specs=pl.BlockSpec((TB, Dout_last), lambda i: (i, 0)),
        compiler_params=pltpu.CompilerParams(
            dimension_semantics=("parallel",),                # shard batch on v7x 2-TC
            vmem_limit_bytes=vmem_limit),
    )(*operands)

    return out[:B, :n_out]


# ----------------------------------------------------------------------------
# Classifier: matches the PyTorch module's forward semantics.
# ----------------------------------------------------------------------------
class ClassifierPallas:
    # TODO(synk): activation is fixed to ReLU (the module's default); arbitrary
    # Python activation callables are not mapped.
    def __init__(self, sizes, key, activation_on_final_layer=False,
                 matmul_dtype="float32"):
        self.sizes = list(sizes)
        self.activation_on_final_layer = activation_on_final_layer
        self.n_layers = len(sizes) - 1
        store_dtype = jnp.bfloat16 if matmul_dtype == "bfloat16" else jnp.float32

        # PyTorch-layout params (kept for the reference check).
        self.params = []
        for n_in, n_out in zip(sizes[:-1], sizes[1:]):
            key, wk, bk = jax.random.split(key, 3)
            bound = 1.0 / (n_in ** 0.5)
            w = jax.random.uniform(wk, (n_out, n_in), jnp.float32, -bound, bound)
            b = jax.random.uniform(bk, (n_out,), jnp.float32, -bound, bound)
            self.params.append((w, b))

        # Per-layer padding: pre-transpose to (n_in, n_out) layout and zero-pad
        # each dim independently to a multiple of 128.  Weights are stored in
        # the MXU input dtype so the bf16 path never casts a resident operand
        # inside the kernel; biases stay f32 for the f32 epilogue.
        ws, bs = [], []
        for (w, b) in self.params:
            n_out_i, n_in_i = w.shape
            din, dout = _round_up(n_in_i, 128), _round_up(n_out_i, 128)
            wp = jnp.zeros((din, dout), jnp.float32).at[:n_in_i, :n_out_i].set(w.T)
            bp = jnp.zeros((1, dout), jnp.float32).at[0, :n_out_i].set(b)
            ws.append(jax.device_put(wp.astype(store_dtype)))
            bs.append(jax.device_put(bp))
        self.ws, self.bs = tuple(ws), tuple(bs)

    def __call__(self, x):
        return _classifier_forward(
            x, self.ws, self.bs,
            n_out=self.sizes[-1],
            act_on_final=self.activation_on_final_layer)


# ----------------------------------------------------------------------------
# Reference (plain JAX) for sanity checking.
# ----------------------------------------------------------------------------
def classifier_ref(params, x, activation_on_final_layer=False):
    n_layers = len(params)
    for i, (w, b) in enumerate(params):
        x = x @ w.T + b
        if (i != n_layers - 1) or activation_on_final_layer:
            x = jnp.maximum(x, 0.0)
    return x


if __name__ == "__main__":
    key = jax.random.PRNGKey(0)
    key, xk, x2k, pk = jax.random.split(key, 4)

    sizes = [32, 64, 16, 4]

    # Small batch: single tile, grid=(1,).
    x = jax.random.normal(xk, (8, sizes[0]), jnp.float32)
    model_f32 = ClassifierPallas(sizes, pk, matmul_dtype="float32")
    out = jax.block_until_ready(model_f32(x))
    ref = classifier_ref(model_f32.params, x)
    assert out.shape == (8, sizes[-1])
    assert jnp.allclose(out, ref, atol=1e-5, rtol=1e-5), "f32 mismatch vs reference"

    # Medium batch: exercises the 2-tile "parallel" batch grid.
    x2 = jax.random.normal(x2k, (40, sizes[0]), jnp.float32)
    out2 = jax.block_until_ready(model_f32(x2))
    ref2 = classifier_ref(model_f32.params, x2)
    assert out2.shape == (40, sizes[-1])
    assert jnp.allclose(out2, ref2, atol=1e-5, rtol=1e-5), "f32 tiled mismatch"

    # bf16 MXU path (weights pre-cast at init; f32 accumulation + epilogue).
    model_bf16 = ClassifierPallas(sizes, pk, matmul_dtype="bfloat16")
    out_bf16 = jax.block_until_ready(model_bf16(x))
    assert out_bf16.shape == (8, sizes[-1])
    assert jnp.allclose(out_bf16, ref, atol=5e-2, rtol=5e-2), "bf16 mismatch vs reference"

    print("KERNEL_OK")
</pallas_src>

<mosaic_0001>
module attributes {stable_mosaic.version = 11 : i64} {
  func.func @_mlp_kernel(%arg0: i32, %arg1: memref<8x128xf32, #tpu.memory_space<vmem>>, %arg2: memref<128x128xf32, #tpu.memory_space<vmem>>, %arg3: memref<1x128xf32, #tpu.memory_space<vmem>>, %arg4: memref<128x128xf32, #tpu.memory_space<vmem>>, %arg5: memref<1x128xf32, #tpu.memory_space<vmem>>, %arg6: memref<128x128xf32, #tpu.memory_space<vmem>>, %arg7: memref<1x128xf32, #tpu.memory_space<vmem>>, %arg8: memref<8x128xf32, #tpu.memory_space<vmem>>) attributes {dimension_semantics = [#tpu.dimension_semantics<parallel>], iteration_bounds = array<i64: 1>, scalar_prefetch = 0 : i64, scratch_operands = 0 : i64, tpu.core_type = #tpu.core_type<tc>, window_params = [{transform_indices = @transform_0, window_bounds = array<i64: 8, 128>}, {pipeline_mode = #tpu.pipeline_mode<synchronous>, transform_indices = @transform_1, window_bounds = array<i64: 128, 128>}, {pipeline_mode = #tpu.pipeline_mode<synchronous>, transform_indices = @transform_2, window_bounds = array<i64: 1, 128>}, {pipeline_mode = #tpu.pipeline_mode<synchronous>, transform_indices = @transform_3, window_bounds = array<i64: 128, 128>}, {pipeline_mode = #tpu.pipeline_mode<synchronous>, transform_indices = @transform_4, window_bounds = array<i64: 1, 128>}, {pipeline_mode = #tpu.pipeline_mode<synchronous>, transform_indices = @transform_5, window_bounds = array<i64: 128, 128>}, {pipeline_mode = #tpu.pipeline_mode<synchronous>, transform_indices = @transform_6, window_bounds = array<i64: 1, 128>}, {transform_indices = @transform_7, window_bounds = array<i64: 8, 128>}]} {
    %c0 = arith.constant 0 : index
    %c0_0 = arith.constant 0 : index
    %0 = vector.load %arg1[%c0, %c0_0] : memref<8x128xf32, #tpu.memory_space<vmem>>, vector<8x128xf32>
    %c0_1 = arith.constant 0 : index
    %c0_2 = arith.constant 0 : index
    %1 = vector.load %arg2[%c0_1, %c0_2] : memref<128x128xf32, #tpu.memory_space<vmem>>, vector<128x128xf32>
    %cst = arith.constant dense<0.000000e+00> : vector<8x128xf32>
    %2 = tpu.matmul %0, %1, %cst {dimension_numbers = #tpu.dot_dimension_numbers<[1], [0], [0], [1], [0, 0, 1, 1], [], []>} : vector<8x128xf32>, vector<128x128xf32>, vector<8x128xf32> -> vector<8x128xf32>
    %c0_3 = arith.constant 0 : index
    %c0_4 = arith.constant 0 : index
    %3 = vector.load %arg3[%c0_3, %c0_4] : memref<1x128xf32, #tpu.memory_space<vmem>>, vector<1x128xf32>
    %4 = vector.broadcast %3 : vector<1x128xf32> to vector<8x128xf32>
    %5 = arith.addf %2, %4 : vector<8x128xf32>
    %cst_5 = arith.constant 0.000000e+00 : f32
    %6 = vector.broadcast %cst_5 : f32 to vector<8x128xf32>
    %7 = arith.maximumf %5, %6 : vector<8x128xf32>
    %c0_6 = arith.constant 0 : index
    %c0_7 = arith.constant 0 : index
    %8 = vector.load %arg4[%c0_6, %c0_7] : memref<128x128xf32, #tpu.memory_space<vmem>>, vector<128x128xf32>
    %cst_8 = arith.constant dense<0.000000e+00> : vector<8x128xf32>
    %9 = tpu.matmul %7, %8, %cst_8 {dimension_numbers = #tpu.dot_dimension_numbers<[1], [0], [0], [1], [0, 0, 1, 1], [], []>} : vector<8x128xf32>, vector<128x128xf32>, vector<8x128xf32> -> vector<8x128xf32>
    %c0_9 = arith.constant 0 : index
    %c0_10 = arith.constant 0 : index
    %10 = vector.load %arg5[%c0_9, %c0_10] : memref<1x128xf32, #tpu.memory_space<vmem>>, vector<1x128xf32>
    %11 = vector.broadcast %10 : vector<1x128xf32> to vector<8x128xf32>
    %12 = arith.addf %9, %11 : vector<8x128xf32>
    %cst_11 = arith.constant 0.000000e+00 : f32
    %13 = vector.broadcast %cst_11 : f32 to vector<8x128xf32>
    %14 = arith.maximumf %12, %13 : vector<8x128xf32>
    %c0_12 = arith.constant 0 : index
    %c0_13 = arith.constant 0 : index
    %15 = vector.load %arg6[%c0_12, %c0_13] : memref<128x128xf32, #tpu.memory_space<vmem>>, vector<128x128xf32>
    %cst_14 = arith.constant dense<0.000000e+00> : vector<8x128xf32>
    %16 = tpu.matmul %14, %15, %cst_14 {dimension_numbers = #tpu.dot_dimension_numbers<[1], [0], [0], [1], [0, 0, 1, 1], [], []>} : vector<8x128xf32>, vector<128x128xf32>, vector<8x128xf32> -> vector<8x128xf32>
    %c0_15 = arith.constant 0 : index
    %c0_16 = arith.constant 0 : index
    %17 = vector.load %arg7[%c0_15, %c0_16] : memref<1x128xf32, #tpu.memory_space<vmem>>, vector<1x128xf32>
    %18 = vector.broadcast %17 : vector<1x128xf32> to vector<8x128xf32>
    %19 = arith.addf %16, %18 : vector<8x128xf32>
    %c0_17 = arith.constant 0 : index
    %c0_18 = arith.constant 0 : index
    %20 = vector.load %arg8[%c0_17, %c0_18] : memref<8x128xf32, #tpu.memory_space<vmem>>, vector<8x128xf32>
    tpu.vector_store %arg8[%c0_17, %c0_18], %19 {strides = array<i32>} : memref<8x128xf32, #tpu.memory_space<vmem>>, vector<8x128xf32>,
    return
  }
  func.func @transform_0(%arg0: i32) -> (i32, i32) {
    %c0_i32 = arith.constant 0 : i32
    %c0_i32_0 = arith.constant 0 : i32
    return %arg0, %c0_i32 : i32, i32
  }
  func.func @transform_1(%arg0: i32) -> (i32, i32) {
    %c0_i32 = arith.constant 0 : i32
    %c0_i32_0 = arith.constant 0 : i32
    %c0_i32_1 = arith.constant 0 : i32
    return %c0_i32, %c0_i32_0 : i32, i32
  }
  func.func @transform_2(%arg0: i32) -> (i32, i32) {
    %c0_i32 = arith.constant 0 : i32
    %c0_i32_0 = arith.constant 0 : i32
    %c0_i32_1 = arith.constant 0 : i32
    return %c0_i32, %c0_i32_0 : i32, i32
  }
  func.func @transform_3(%arg0: i32) -> (i32, i32) {
    %c0_i32 = arith.constant 0 : i32
    %c0_i32_0 = arith.constant 0 : i32
    %c0_i32_1 = arith.constant 0 : i32
    return %c0_i32, %c0_i32_0 : i32, i32
  }
  func.func @transform_4(%arg0: i32) -> (i32, i32) {
    %c0_i32 = arith.constant 0 : i32
    %c0_i32_0 = arith.constant 0 : i32
    %c0_i32_1 = arith.constant 0 : i32
    return %c0_i32, %c0_i32_0 : i32, i32
  }
  func.func @transform_5(%arg0: i32) -> (i32, i32) {
    %c0_i32 = arith.constant 0 : i32
    %c0_i32_0 = arith.constant 0 : i32
    %c0_i32_1 = arith.constant 0 : i32
    return %c0_i32, %c0_i32_0 : i32, i32
  }
  func.func @transform_6(%arg0: i32) -> (i32, i32) {
    %c0_i32 = arith.constant 0 : i32
    %c0_i32_0 = arith.constant 0 : i32
    %c0_i32_1 = arith.constant 0 : i32
    return %c0_i32, %c0_i32_0 : i32, i32
  }
  func.func @transform_7(%arg0: i32) -> (i32, i32) {
    %c0_i32 = arith.constant 0 : i32
    %c0_i32_0 = arith.constant 0 : i32
    return %arg0, %c0_i32 : i32, i32
  }
}

</mosaic_0001>

<bundles_post_ra>
// kernel: _classifier_forward.1
= control target key start
LH: loop header
LB: loop body
LE: loop exit
PB: predicated region body
PF: predicated region fallthrough
CT: control target
= control target key end

     0   :  { %12 = vsyncpa [#allocation3], 0  ;;  %s356_s0 = inlined_call_operand.vmem [shape: f32[8,128], index: 0, kind: input, shape index: {}]   ;;  %s357_s1 = inlined_call_operand.hbm [shape: f32[128,128], index: 1, kind: input, shape index: {}]   ;;  %s358_s2 = inlined_call_operand.vmem [shape: f32[1,128], index: 2, kind: input, shape index: {}]   ;;  %s359_s3 = inlined_call_operand.hbm [shape: f32[128,128], index: 3, kind: input, shape index: {}]   ;;  %s360_s4 = inlined_call_operand.vmem [shape: f32[1,128], index: 4, kind: input, shape index: {}]   ;;  %s361_s5 = inlined_call_operand.hbm [shape: f32[128,128], index: 5, kind: input, shape index: {}]   ;;  %s362_s6 = inlined_call_operand.vmem [shape: f32[1,128], index: 6, kind: input, shape index: {}]   ;;  %s363_s7 = inlined_call_operand.vmem [shape: f32[8,128], index: 7, kind: output, shape index: {}]  }
   0x1   :  { %13 = vsyncpa [#allocation5], 0  ;;  %s35_s26 = sshll.u32 %s359_s3, 4  ;;  %s287_s27 = smov [#allocation4]   ;;  %s36_s26 = int_to_ptr.hbm [resolvable:$true] %s35_s26 }
   0x2   :  { %s37_s28 = sshll.u32 %s287_s27, 4  ;;  %s20_s8 = sshll.u32 %s357_s1, 4  ;;  %s38_s28 = int_to_ptr.vmem [resolvable:$true] %s37_s28  ;;  %s21_s8 = int_to_ptr.hbm [resolvable:$true] %s20_s8 }
   0x3   :  { %s288_s9 = smov 128   ;;  %s289_s10 = smov 8  }
   0x4   :  { %43 = dma.hbm_to_vmem [thread:$0]  %s36_s26, 2048, %s38_s28, [#allocation5], %s288_s9, %s288_s9, %s289_s10  }
   0x5   :  { %s290_s11 = smov [#allocation2]   ;;  %s50_s15 = sshll.u32 %s361_s5, 4  ;;  %s51_s15 = int_to_ptr.hbm [resolvable:$true] %s50_s15 }
   0x6   :  { %s22_s12 = sshll.u32 %s290_s11, 4  ;;  %s291_s3 = smov [#allocation6]   ;;  %s23_s12 = int_to_ptr.vmem [resolvable:$true] %s22_s12 }
   0x7   :  { %28 = dma.hbm_to_vmem [thread:$0]  %s21_s8, 2048, %s23_s12, [#allocation3], %s288_s9, %s288_s9, %s289_s10  }
   0x8   :  { %s52_s16 = sshll.u32 %s291_s3, 4  ;;  %s53_s16 = int_to_ptr.vmem [resolvable:$true] %s52_s16 }
   0x9   :  { %58 = dma.hbm_to_vmem [thread:$0]  %s51_s15, 2048, %s53_s16, [#allocation5], %s288_s9, %s288_s9, %s289_s10  }
   0xa   :  { %283 = dma.done.wait [#allocation3], 2048  }
   0xb   :  { %284 = vsyncadd [#allocation3], 4294965248 }
   0xc   :  { %285 = dma.done.wait [#allocation5], 4096  }
   0xd   :  { %286 = vsyncadd [#allocation5], 4294963200  ;;  %v89_v0 = vld [vmem:[#allocation2 + $0x78] sm:$0xff]  ;;  %v88_v1 = vld [vmem:[#allocation2 + $0x70] sm:$0xff] }
   0xe   :  { %94 = vmatpush.msra.mxu0 %v89_v0  ;;  %v87_v2 = vld [vmem:[#allocation2 + $0x68] sm:$0xff]  ;;  %v86_v3 = vld [vmem:[#allocation2 + $0x60] sm:$0xff]  ;;  %v130_v4 = vld [vmem:[#allocation4 + $0x78] sm:$0xff] }
   0xf   :  { %v85_v5 = vld [vmem:[#allocation2 + $0x58] sm:$0xff]  ;;  %135 = vmatpush.msra.mxu1 %v130_v4  ;;  %v129_v6 = vld [vmem:[#allocation4 + $0x70] sm:$0xff]  ;;  %v128_v7 = vld [vmem:[#allocation4 + $0x68] sm:$0xff] }
  0x10   :  { %95 = vmatpush.msra.mxu0 %v88_v1  ;;  %v84_v8 = vld [vmem:[#allocation2 + $0x50] sm:$0xff]  ;;  %v127_v9 = vld [vmem:[#allocation4 + $0x60] sm:$0xff]  ;;  %v83_v10 = vld [vmem:[#allocation2 + $0x48] sm:$0xff] }
  0x11   :  { %136 = vmatpush.msra.mxu1 %v129_v6  ;;  %v126_v11 = vld [vmem:[#allocation4 + $0x58] sm:$0xff]  ;;  %v82_v12 = vld [vmem:[#allocation2 + $0x40] sm:$0xff]  ;;  %v125_v13 = vld [vmem:[#allocation4 + $0x50] sm:$0xff] }
  0x12   :  { %96 = vmatpush.msra.mxu0 %v87_v2  ;;  %v81_v14 = vld [vmem:[#allocation2 + $0x38] sm:$0xff]  ;;  %v124_v15 = vld [vmem:[#allocation4 + $0x48] sm:$0xff]  ;;  %v80_v16 = vld [vmem:[#allocation2 + $0x30] sm:$0xff] }
  0x13   :  { %137 = vmatpush.msra.mxu1 %v128_v7  ;;  %v123_v17 = vld [vmem:[#allocation4 + $0x40] sm:$0xff]  ;;  %v79_v18 = vld [vmem:[#allocation2 + $0x28] sm:$0xff]  ;;  %v122_v19 = vld [vmem:[#allocation4 + $0x38] sm:$0xff] }
  0x14   :  { %97 = vmatpush.msra.mxu0 %v86_v3  ;;  %v78_v20 = vld [vmem:[#allocation2 + $0x20] sm:$0xff]  ;;  %v121_v21 = vld [vmem:[#allocation4 + $0x30] sm:$0xff]  ;;  %v77_v22 = vld [vmem:[#allocation2 + $0x18] sm:$0xff] }
  0x15   :  { %138 = vmatpush.msra.mxu1 %v127_v9  ;;  %v120_v23 = vld [vmem:[#allocation4 + $0x28] sm:$0xff]  ;;  %v76_v24 = vld [vmem:[#allocation2 + $0x10] sm:$0xff]  ;;  %v119_v25 = vld [vmem:[#allocation4 + $0x20] sm:$0xff] }
  0x16   :  { %98 = vmatpush.msra.mxu0 %v85_v5  ;;  %v75_v26 = vld [vmem:[#allocation2 + $0x8] sm:$0xff]  ;;  %v118_v27 = vld [vmem:[#allocation4 + $0x18] sm:$0xff]  ;;  %v74_v28 = vld [vmem:[#allocation2] sm:$0xff] }
  0x17   :  { %139 = vmatpush.msra.mxu1 %v126_v11  ;;  %v73_v29 = vld [vmem:[%s356_s0] sm:$0xff]  ;;  %v117_v30 = vld [vmem:[#allocation4 + $0x10] sm:$0xff]  ;;  %v116_v31 = vld [vmem:[#allocation4 + $0x8] sm:$0xff] }
  0x18   :  { %99 = vmatpush.msra.mxu0 %v84_v8  ;;  %v115_v32 = vld [vmem:[#allocation4] sm:$0xff]  ;;  %v171_v33 = vld [vmem:[#allocation6 + $0x78] sm:$0xff]  ;;  %v170_v34 = vld [vmem:[#allocation6 + $0x70] sm:$0xff] }
  0x19   :  { %140 = vmatpush.msra.mxu1 %v125_v13  ;;  %176 = vmatpush.msra.mxu2 %v171_v33  ;;  %v169_v35 = vld [vmem:[#allocation6 + $0x68] sm:$0xff]  ;;  %v168_v36 = vld [vmem:[#allocation6 + $0x60] sm:$0xff]  ;;  %v167_v37 = vld [vmem:[#allocation6 + $0x58] sm:$0xff] }
  0x1a   :  { %100 = vmatpush.msra.mxu0 %v83_v10  ;;  %v166_v38 = vld [vmem:[#allocation6 + $0x50] sm:$0xff]  ;;  %v165_v39 = vld [vmem:[#allocation6 + $0x48] sm:$0xff]  ;;  %v164_v40 = vld [vmem:[#allocation6 + $0x40] sm:$0xff] }
  0x1b   :  { %141 = vmatpush.msra.mxu1 %v124_v15  ;;  %177 = vmatpush.msra.mxu2 %v170_v34  ;;  %v163_v41 = vld [vmem:[#allocation6 + $0x38] sm:$0xff]  ;;  %v162_v42 = vld [vmem:[#allocation6 + $0x30] sm:$0xff]  ;;  %v161_v43 = vld [vmem:[#allocation6 + $0x28] sm:$0xff] }
  0x1c   :  { %101 = vmatpush.msra.mxu0 %v82_v12  ;;  %v160_v44 = vld [vmem:[#allocation6 + $0x20] sm:$0xff]  ;;  %v159_v45 = vld [vmem:[#allocation6 + $0x18] sm:$0xff]  ;;  %v158_v50 = vld [vmem:[#allocation6 + $0x10] sm:$0xff] }
  0x1d   :  { %142 = vmatpush.msra.mxu1 %v123_v17  ;;  %178 = vmatpush.msra.mxu2 %v169_v35  ;;  %v208_v46 = vld [vmem:[%s358_s2] ss:$0 sm:$0xff]  ;;  %v157_v51 = vld [vmem:[#allocation6 + $0x8] sm:$0xff] }
  0x1e   :  { %102 = vmatpush.msra.mxu0 %v81_v14  ;;  %v156_v52 = vld [vmem:[#allocation6] sm:$0xff] }
  0x1f   :  { %143 = vmatpush.msra.mxu1 %v122_v19  ;;  %179 = vmatpush.msra.mxu2 %v168_v36  ;;  %v209_v53 = vld [vmem:[%s360_s4] ss:$0 sm:$0xff] }
  0x20   :  { %103 = vmatpush.msra.mxu0 %v80_v16  ;;  %v210_v57 = vld [vmem:[%s362_s6] ss:$0 sm:$0xff] }
  0x21   :  { %144 = vmatpush.msra.mxu1 %v121_v21  ;;  %180 = vmatpush.msra.mxu2 %v167_v37 }
  0x22   :  { %104 = vmatpush.msra.mxu0 %v79_v18 }
  0x23   :  { %145 = vmatpush.msra.mxu1 %v120_v23  ;;  %181 = vmatpush.msra.mxu2 %v166_v38 }
  0x24   :  { %105 = vmatpush.msra.mxu0 %v78_v20 }
  0x25   :  { %146 = vmatpush.msra.mxu1 %v119_v25  ;;  %182 = vmatpush.msra.mxu2 %v165_v39 }
  0x26   :  { %106 = vmatpush.msra.mxu0 %v77_v22 }
  0x27   :  { %147 = vmatpush.msra.mxu1 %v118_v27  ;;  %183 = vmatpush.msra.mxu2 %v164_v40 }
  0x28   :  { %107 = vmatpush.msra.mxu0 %v76_v24 }
  0x29   :  { %148 = vmatpush.msra.mxu1 %v117_v30  ;;  %184 = vmatpush.msra.mxu2 %v163_v41 }
  0x2a   :  { %108 = vmatpush.msra.mxu0 %v75_v26 }
  0x2b   :  { %149 = vmatpush.msra.mxu1 %v116_v31  ;;  %185 = vmatpush.msra.mxu2 %v162_v42 }
  0x2c   :  { %109 = vmatpush.msra.mxu0 %v74_v28 }
  0x2d   :  { %110 = vmatmul.f32.vlgmr.msra.gmra.mxu0 %v73_v29  ;;  %150 = vmatpush.msra.mxu1 %v115_v32 }
  0x2e   :  { %186 = vmatpush.msra.mxu2 %v161_v43 }
  0x30   :  { %187 = vmatpush.msra.mxu2 %v160_v44 }
  0x32   :  { %188 = vmatpush.msra.mxu2 %v159_v45 }
  0x34   :  { %189 = vmatpush.msra.mxu2 %v158_v50 }
  0x36   :  { %190 = vmatpush.msra.mxu2 %v157_v51 }
  0x38   :  { %191 = vmatpush.msra.mxu2 %v156_v52 }
  0xaa   :  { %v111_v47 = vpop.f32.mrf.mxu0 }
  0xab   :  { %v112_v48 = vadd.f32 %v208_v46, %v111_v47 }
  0xad   :  { %v114_v49 = vmax.f32 %v112_v48, 0.0 }
  0xaf   :  { %151 = vmatmul.f32.vlgmr.msra.gmra.mxu1 %v114_v49 }
 0x12c   :  { %v152_v54 = vpop.f32.mrf.mxu1 }
 0x12d   :  { %v153_v55 = vadd.f32 %v209_v53, %v152_v54 }
 0x12f   :  { %v155_v56 = vmax.f32 %v153_v55, 0.0 }
 0x131   :  { %192 = vmatmul.f32.vlgmr.msra.gmra.mxu2 %v155_v56 }
 0x1b4   :  { %v193_v58 = vpop.f32.mrf.mxu2 }
 0x1b5   :  { %v194_v59 = vadd.f32 %v210_v57, %v193_v58 }
 0x1b7   :  { %196 = vst [vmem:[%s363_s7] sm:$0xff] %v194_v59 }
 0x1b8   :  { %201 = vsyncpa [#allocation3], 1 }
 0x1b9   :  { %202 = vsyncpa [#allocation5], 1 }

</bundles_post_ra>
